<compile_context>
chip_gen: v6e
topology: v6e:2x2x1
jax: 0.10.0
libtpu: 0.0.40
codegen_flags: <defaults>
</compile_context>

<pallas_src>
import jax
import jax.numpy as jnp
from jax.experimental import pallas as pl
from jax.experimental.pallas import tpu as pltpu

GN_EPS = 1e-5
NUM_GROUPS = 8                      # GroupNorm(8, ch_in) in the PyTorch module
VMEM_LIMIT = 32 * 1024 * 1024       # explicit scoped-VMEM limit (safe on v5e/v6e/v7x)


def _ceil_to(x, m):
    return ((x + m - 1) // m) * m


def _divisor_tile(total, max_tile, quantum):
    """Largest multiple of `quantum` that divides `total` and is <= max_tile."""
    best = quantum
    for t in range(quantum, max_tile + 1, quantum):
        if total % t == 0:
            best = t
    return best


# ---------------- GroupNorm stats (tiled Pallas reduction) ----------------

def _gn_stats_kernel(x_ref, sum_ref, sq_ref):
    # x_ref: (rows, tcol) tile of the (N*C, S_pad) slab.  Column axis (grid axis 1)
    # is the reduction; the output blocks stay resident across it (accumulator).
    @pl.when(pl.program_id(1) == 0)
    def _():
        sum_ref[...] = jnp.zeros_like(sum_ref)
        sq_ref[...] = jnp.zeros_like(sq_ref)

    x = x_ref[...].astype(jnp.float32)
    sum_ref[...] += jnp.sum(x, axis=-1, keepdims=True)
    sq_ref[...] += jnp.sum(x * x, axis=-1, keepdims=True)


# ---------------- normalize + ReLU (tiled elementwise Pallas kernel) ----------------

def _gn_norm_relu_kernel(x_ref, scale_ref, shift_ref, o_ref):
    # scale/shift are (rows, 1) per-(n,c) blocks, broadcast along the lane axis.
    x = x_ref[...].astype(jnp.float32)
    y = x * scale_ref[...] + shift_ref[...]
    o_ref[...] = jnp.maximum(y, 0.0).astype(o_ref.dtype)


def groupnorm_relu(x, gamma, beta):
    N, C, D, H, W = x.shape
    G = NUM_GROUPS
    Cg = C // G
    S = D * H * W
    NC = N * C

    tcol = min(2048, _ceil_to(S, 128))
    S_pad = _ceil_to(S, tcol)
    rblk = _divisor_tile(NC, 64, 8)

    x2 = x.reshape(NC, S)
    if S_pad != S:
        x2 = jnp.pad(x2, ((0, 0), (0, S_pad - S)))   # zero pad: contributes 0 to stats

    # ---- pass 1: per-(n, c) sum / sumsq ----
    sums, sqs = pl.pallas_call(
        _gn_stats_kernel,
        out_shape=(jax.ShapeDtypeStruct((NC, 1), jnp.float32),
                   jax.ShapeDtypeStruct((NC, 1), jnp.float32)),
        grid=(NC // rblk, S_pad // tcol),
        in_specs=[pl.BlockSpec((rblk, tcol), lambda r, c: (r, c))],
        out_specs=(pl.BlockSpec((rblk, 1), lambda r, c: (r, 0)),
                   pl.BlockSpec((rblk, 1), lambda r, c: (r, 0))),
        compiler_params=pltpu.CompilerParams(
            dimension_semantics=("parallel", "arbitrary"),
            vmem_limit_bytes=VMEM_LIMIT),
    )(x2)

    # ---- tiny glue: per-group mean/inv -> per-channel scale/shift (O(N*C)) ----
    cnt = float(Cg * S)
    sums_g = sums.reshape(N, G, Cg).sum(axis=-1)
    sqs_g = sqs.reshape(N, G, Cg).sum(axis=-1)
    mean = sums_g / cnt
    var = sqs_g / cnt - mean * mean
    inv = jax.lax.rsqrt(var + GN_EPS)                       # (N, G)
    inv_c = jnp.repeat(inv, Cg, axis=1)                     # (N, C)
    mean_c = jnp.repeat(mean, Cg, axis=1)
    scale = inv_c * gamma[None, :]                          # (N, C)
    shift = beta[None, :] - mean_c * scale
    scale = scale.reshape(NC, 1).astype(jnp.float32)
    shift = shift.reshape(NC, 1).astype(jnp.float32)

    # ---- pass 2: normalize + ReLU ----
    y2 = pl.pallas_call(
        _gn_norm_relu_kernel,
        out_shape=jax.ShapeDtypeStruct((NC, S_pad), x.dtype),
        grid=(NC // rblk, S_pad // tcol),
        in_specs=[pl.BlockSpec((rblk, tcol), lambda r, c: (r, c)),
                  pl.BlockSpec((rblk, 1), lambda r, c: (r, 0)),
                  pl.BlockSpec((rblk, 1), lambda r, c: (r, 0))],
        out_specs=pl.BlockSpec((rblk, tcol), lambda r, c: (r, c)),
        compiler_params=pltpu.CompilerParams(
            dimension_semantics=("parallel", "parallel"),
            vmem_limit_bytes=VMEM_LIMIT),
    )(x2, scale, shift)

    return y2[:, :S].reshape(N, C, D, H, W)


# ---------------- Conv3d k=3, stride=2, pad=1 (im2col glue + tiled Pallas matmul) ----------------

def _conv_matmul_kernel(w_ref, p_ref, o_ref, acc_ref):
    # w_ref: (Cout, tk), p_ref: (1, tk, ts), acc_ref: (Cout, ts) f32 accumulator.
    # Grid axis 2 (K tiles) is the reduction: init at k==0, write out at the last k.
    @pl.when(pl.program_id(2) == 0)
    def _():
        acc_ref[...] = jnp.zeros_like(acc_ref)

    acc_ref[...] += jnp.dot(w_ref[...], p_ref[0],
                            preferred_element_type=jnp.float32)

    @pl.when(pl.program_id(2) == pl.num_programs(2) - 1)
    def _():
        o_ref[0] = acc_ref[...].astype(o_ref.dtype)


def conv3d_stride2(y, w, b, *, max_ts=1024, max_tk=1024):
    N, C, D, H, W = y.shape
    Cout = w.shape[0]
    K = 3
    Do, Ho, Wo = (D - 1) // 2 + 1, (H - 1) // 2 + 1, (W - 1) // 2 + 1
    S_out = Do * Ho * Wo
    Kdim = C * K * K * K

    # im2col in plain JAX: 27 strided slices of the zero-padded activation.
    # TODO(synk): move the 27-tap gather in-kernel (manual DMA over a phase-decomposed
    # input) to avoid materializing the 27x patch tensor in HBM for large volumes.
    yp = jnp.pad(y, ((0, 0), (0, 0), (1, 1), (1, 1), (1, 1)))
    cols = []
    for kd in range(K):
        for kh in range(K):
            for kw in range(K):
                cols.append(yp[:, :,
                               kd:kd + 2 * Do - 1:2,
                               kh:kh + 2 * Ho - 1:2,
                               kw:kw + 2 * Wo - 1:2])
    patches = jnp.stack(cols, axis=2).reshape(N, Kdim, S_out)   # (c, kd, kh, kw) order

    # Pad contraction dim to a 128-multiple; row `Kdim` is an all-ones row so the bias
    # becomes one extra weight column.  Pad S_out to a lane-dense 128-multiple tile.
    Kpad = _ceil_to(Kdim + 1, 128)
    ts = min(max_ts, _ceil_to(S_out, 128))
    S_pad = _ceil_to(S_out, ts)
    tk = _divisor_tile(Kpad, max_tk, 128)

    patches = jnp.pad(patches, ((0, 0), (0, Kpad - Kdim), (0, S_pad - S_out)))
    patches = patches.at[:, Kdim, :].set(jnp.asarray(1.0, patches.dtype))

    w2p = jnp.concatenate(
        [w.reshape(Cout, Kdim).astype(jnp.float32),
         b.reshape(Cout, 1).astype(jnp.float32),
         jnp.zeros((Cout, Kpad - Kdim - 1), jnp.float32)], axis=1)

    out = pl.pallas_call(
        _conv_matmul_kernel,
        out_shape=jax.ShapeDtypeStruct((N, Cout, S_pad), y.dtype),
        grid=(N, S_pad // ts, Kpad // tk),
        in_specs=[
            pl.BlockSpec((Cout, tk), lambda n, s, k: (0, k)),
            pl.BlockSpec((1, tk, ts), lambda n, s, k: (n, k, s)),
        ],
        out_specs=pl.BlockSpec((1, Cout, ts), lambda n, s, k: (n, 0, s)),
        scratch_shapes=[pltpu.VMEM((Cout, ts), jnp.float32)],
        compiler_params=pltpu.CompilerParams(
            dimension_semantics=("parallel", "parallel", "arbitrary"),
            vmem_limit_bytes=VMEM_LIMIT),
    )(w2p, patches)

    return out[:, :, :S_out].reshape(N, Cout, Do, Ho, Wo)


# ---------------- downconv forward (defaults: maxpool=False, act=True, preact=True) ----------------
# TODO(synk): the maxpool=True / preact=False / act=False branches are not exercised by default args.

@jax.jit
def downconv_forward(x, gn_gamma, gn_beta, conv_w, conv_b):
    y = groupnorm_relu(x, gn_gamma, gn_beta)
    return conv3d_stride2(y, conv_w, conv_b)


# ---------------- pure-JAX reference for verification ----------------

def reference(x, gamma, beta, w, b):
    N, C, D, H, W = x.shape
    G = NUM_GROUPS
    xr = x.reshape(N, G, -1)
    mean = xr.mean(-1, keepdims=True)
    var = ((xr - mean) ** 2).mean(-1, keepdims=True)
    y = (xr - mean) / jnp.sqrt(var + GN_EPS)
    y = y.reshape(N, C, D, H, W)
    y = y * gamma[None, :, None, None, None] + beta[None, :, None, None, None]
    y = jnp.maximum(y, 0.0)
    out = jax.lax.conv_general_dilated(
        y, w, window_strides=(2, 2, 2), padding=((1, 1), (1, 1), (1, 1)),
        dimension_numbers=("NCDHW", "OIDHW", "NCDHW"))
    return out + b[None, :, None, None, None]


if __name__ == "__main__":
    key = jax.random.PRNGKey(0)
    k1, k2, k3, k4, k5 = jax.random.split(key, 5)

    N, Cin, Cout = 2, 8, 16
    D = H = W = 8

    x = jax.random.normal(k1, (N, Cin, D, H, W), dtype=jnp.float32)
    gn_gamma = 1.0 + 0.1 * jax.random.normal(k2, (Cin,), dtype=jnp.float32)
    gn_beta = 0.1 * jax.random.normal(k3, (Cin,), dtype=jnp.float32)
    conv_w = 0.05 * jax.random.normal(k4, (Cout, Cin, 3, 3, 3), dtype=jnp.float32)
    conv_b = 0.05 * jax.random.normal(k5, (Cout,), dtype=jnp.float32)

    out = downconv_forward(x, gn_gamma, gn_beta, conv_w, conv_b)
    out = jax.block_until_ready(out)

    assert out.shape == (N, Cout, D // 2, H // 2, W // 2), out.shape
    ref = reference(x, gn_gamma, gn_beta, conv_w, conv_b)
    max_err = float(jnp.max(jnp.abs(out - ref)))
    assert max_err < 2e-3, f"max abs error {max_err}"

    print("KERNEL_OK")
</pallas_src>

<mosaic_0001>
module attributes {stable_mosaic.version = 11 : i64} {
  func.func @_gn_stats_kernel(%arg0: i32, %arg1: i32, %arg2: memref<16x512xf32, #tpu.memory_space<vmem>>, %arg3: memref<16x1xf32, #tpu.memory_space<vmem>>, %arg4: memref<16x1xf32, #tpu.memory_space<vmem>>) attributes {dimension_semantics = [#tpu.dimension_semantics<parallel>, #tpu.dimension_semantics<arbitrary>], iteration_bounds = array<i64: 1, 1>, scalar_prefetch = 0 : i64, scratch_operands = 0 : i64, tpu.core_type = #tpu.core_type<tc>, window_params = [{transform_indices = @transform_0, window_bounds = array<i64: 16, 512>}, {transform_indices = @transform_1, window_bounds = array<i64: 16, 1>}, {transform_indices = @transform_2, window_bounds = array<i64: 16, 1>}]} {
    %c0_i32 = arith.constant 0 : i32
    %0 = arith.cmpi eq, %arg1, %c0_i32 : i32
    %1 = arith.extui %0 : i1 to i32
    %c0_i32_0 = arith.constant 0 : i32
    %2 = arith.cmpi ne, %1, %c0_i32_0 : i32
    scf.if %2 {
      %cst_11 = arith.constant 0.000000e+00 : f32
      %15 = vector.broadcast %cst_11 : f32 to vector<16x1xf32>
      %c0_12 = arith.constant 0 : index
      %c0_13 = arith.constant 0 : index
      %16 = vector.load %arg3[%c0_12, %c0_13] : memref<16x1xf32, #tpu.memory_space<vmem>>, vector<16x1xf32>
      tpu.vector_store %arg3[%c0_12, %c0_13], %15 {strides = array<i32>} : memref<16x1xf32, #tpu.memory_space<vmem>>, vector<16x1xf32>,
      %cst_14 = arith.constant 0.000000e+00 : f32
      %17 = vector.broadcast %cst_14 : f32 to vector<16x1xf32>
      %c0_15 = arith.constant 0 : index
      %c0_16 = arith.constant 0 : index
      %18 = vector.load %arg4[%c0_15, %c0_16] : memref<16x1xf32, #tpu.memory_space<vmem>>, vector<16x1xf32>
      tpu.vector_store %arg4[%c0_15, %c0_16], %17 {strides = array<i32>} : memref<16x1xf32, #tpu.memory_space<vmem>>, vector<16x1xf32>,
    } else {
    }
    %c0 = arith.constant 0 : index
    %c0_1 = arith.constant 0 : index
    %3 = vector.load %arg2[%c0, %c0_1] : memref<16x512xf32, #tpu.memory_space<vmem>>, vector<16x512xf32>
    %c0_2 = arith.constant 0 : index
    %c0_3 = arith.constant 0 : index
    %4 = vector.load %arg3[%c0_2, %c0_3] : memref<16x1xf32, #tpu.memory_space<vmem>>, vector<16x1xf32>
    %cst = arith.constant dense<0.000000e+00> : vector<16xf32>
    %5 = vector.multi_reduction <add>, %3, %cst [1] : vector<16x512xf32> to vector<16xf32>
    %6 = vector.shape_cast %5 : vector<16xf32> to vector<16x1xf32>
    %7 = arith.addf %4, %6 : vector<16x1xf32>
    %c0_4 = arith.constant 0 : index
    %c0_5 = arith.constant 0 : index
    %8 = vector.load %arg3[%c0_4, %c0_5] : memref<16x1xf32, #tpu.memory_space<vmem>>, vector<16x1xf32>
    tpu.vector_store %arg3[%c0_4, %c0_5], %7 {strides = array<i32>} : memref<16x1xf32, #tpu.memory_space<vmem>>, vector<16x1xf32>,
    %c0_6 = arith.constant 0 : index
    %c0_7 = arith.constant 0 : index
    %9 = vector.load %arg4[%c0_6, %c0_7] : memref<16x1xf32, #tpu.memory_space<vmem>>, vector<16x1xf32>
    %10 = arith.mulf %3, %3 : vector<16x512xf32>
    %cst_8 = arith.constant dense<0.000000e+00> : vector<16xf32>
    %11 = vector.multi_reduction <add>, %10, %cst_8 [1] : vector<16x512xf32> to vector<16xf32>
    %12 = vector.shape_cast %11 : vector<16xf32> to vector<16x1xf32>
    %13 = arith.addf %9, %12 : vector<16x1xf32>
    %c0_9 = arith.constant 0 : index
    %c0_10 = arith.constant 0 : index
    %14 = vector.load %arg4[%c0_9, %c0_10] : memref<16x1xf32, #tpu.memory_space<vmem>>, vector<16x1xf32>
    tpu.vector_store %arg4[%c0_9, %c0_10], %13 {strides = array<i32>} : memref<16x1xf32, #tpu.memory_space<vmem>>, vector<16x1xf32>,
    return
  }
  func.func @transform_0(%arg0: i32, %arg1: i32) -> (i32, i32) {
    %c0_i32 = arith.constant 0 : i32
    return %arg0, %arg1 : i32, i32
  }
  func.func @transform_1(%arg0: i32, %arg1: i32) -> (i32, i32) {
    %c0_i32 = arith.constant 0 : i32
    %c0_i32_0 = arith.constant 0 : i32
    return %arg0, %c0_i32 : i32, i32
  }
  func.func @transform_2(%arg0: i32, %arg1: i32) -> (i32, i32) {
    %c0_i32 = arith.constant 0 : i32
    %c0_i32_0 = arith.constant 0 : i32
    return %arg0, %c0_i32 : i32, i32
  }
}

module attributes {stable_mosaic.version = 11 : i64} {
  func.func @_gn_norm_relu_kernel(%arg0: i32, %arg1: i32, %arg2: memref<16x512xf32, #tpu.memory_space<vmem>>, %arg3: memref<16x1xf32, #tpu.memory_space<vmem>>, %arg4: memref<16x1xf32, #tpu.memory_space<vmem>>, %arg5: memref<16x512xf32, #tpu.memory_space<vmem>>) attributes {dimension_semantics = [#tpu.dimension_semantics<parallel>, #tpu.dimension_semantics<parallel>], iteration_bounds = array<i64: 1, 1>, scalar_prefetch = 0 : i64, scratch_operands = 0 : i64, tpu.core_type = #tpu.core_type<tc>, window_params = [{transform_indices = @transform_0, window_bounds = array<i64: 16, 512>}, {transform_indices = @transform_1, window_bounds = array<i64: 16, 1>}, {transform_indices = @transform_2, window_bounds = array<i64: 16, 1>}, {transform_indices = @transform_3, window_bounds = array<i64: 16, 512>}]} {
    %c0 = arith.constant 0 : index
    %c0_0 = arith.constant 0 : index
    %0 = vector.load %arg2[%c0, %c0_0] : memref<16x512xf32, #tpu.memory_space<vmem>>, vector<16x512xf32>
    %c0_1 = arith.constant 0 : index
    %c0_2 = arith.constant 0 : index
    %1 = vector.load %arg3[%c0_1, %c0_2] : memref<16x1xf32, #tpu.memory_space<vmem>>, vector<16x1xf32>
    %2 = vector.broadcast %1 : vector<16x1xf32> to vector<16x512xf32>
    %3 = arith.mulf %0, %2 : vector<16x512xf32>
    %c0_3 = arith.constant 0 : index
    %c0_4 = arith.constant 0 : index
    %4 = vector.load %arg4[%c0_3, %c0_4] : memref<16x1xf32, #tpu.memory_space<vmem>>, vector<16x1xf32>
    %5 = vector.broadcast %4 : vector<16x1xf32> to vector<16x512xf32>
    %6 = arith.addf %3, %5 : vector<16x512xf32>
    %cst = arith.constant 0.000000e+00 : f32
    %7 = vector.broadcast %cst : f32 to vector<16x512xf32>
    %8 = arith.maximumf %6, %7 : vector<16x512xf32>
    %c0_5 = arith.constant 0 : index
    %c0_6 = arith.constant 0 : index
    %9 = vector.load %arg5[%c0_5, %c0_6] : memref<16x512xf32, #tpu.memory_space<vmem>>, vector<16x512xf32>
    tpu.vector_store %arg5[%c0_5, %c0_6], %8 {strides = array<i32>} : memref<16x512xf32, #tpu.memory_space<vmem>>, vector<16x512xf32>,
    return
  }
  func.func @transform_0(%arg0: i32, %arg1: i32) -> (i32, i32) {
    %c0_i32 = arith.constant 0 : i32
    return %arg0, %arg1 : i32, i32
  }
  func.func @transform_1(%arg0: i32, %arg1: i32) -> (i32, i32) {
    %c0_i32 = arith.constant 0 : i32
    %c0_i32_0 = arith.constant 0 : i32
    return %arg0, %c0_i32 : i32, i32
  }
  func.func @transform_2(%arg0: i32, %arg1: i32) -> (i32, i32) {
    %c0_i32 = arith.constant 0 : i32
    %c0_i32_0 = arith.constant 0 : i32
    return %arg0, %c0_i32 : i32, i32
  }
  func.func @transform_3(%arg0: i32, %arg1: i32) -> (i32, i32) {
    %c0_i32 = arith.constant 0 : i32
    return %arg0, %arg1 : i32, i32
  }
}

module attributes {stable_mosaic.version = 11 : i64} {
  func.func @_conv_matmul_kernel(%arg0: i32, %arg1: i32, %arg2: i32, %arg3: memref<16x256xf32, #tpu.memory_space<vmem>>, %arg4: memref<1x256x128xf32, #tpu.memory_space<vmem>>, %arg5: memref<1x16x128xf32, #tpu.memory_space<vmem>>, %arg6: memref<16x128xf32, #tpu.memory_space<vmem>>) attributes {dimension_semantics = [#tpu.dimension_semantics<parallel>, #tpu.dimension_semantics<parallel>, #tpu.dimension_semantics<arbitrary>], iteration_bounds = array<i64: 2, 1, 1>, scalar_prefetch = 0 : i64, scratch_operands = 1 : i64, tpu.core_type = #tpu.core_type<tc>, window_params = [{transform_indices = @transform_0, window_bounds = array<i64: 16, 256>}, {transform_indices = @transform_1, window_bounds = array<i64: 1, 256, 128>}, {transform_indices = @transform_2, window_bounds = array<i64: 1, 16, 128>}]} {
    %c0_i32 = arith.constant 0 : i32
    %0 = arith.cmpi eq, %arg2, %c0_i32 : i32
    %1 = arith.extui %0 : i1 to i32
    %c0_i32_0 = arith.constant 0 : i32
    %2 = arith.cmpi ne, %1, %c0_i32_0 : i32
    scf.if %2 {
      %cst_11 = arith.constant 0.000000e+00 : f32
      %13 = vector.broadcast %cst_11 : f32 to vector<16x128xf32>
      %c0_12 = arith.constant 0 : index
      %c0_13 = arith.constant 0 : index
      %14 = vector.load %arg6[%c0_12, %c0_13] : memref<16x128xf32, #tpu.memory_space<vmem>>, vector<16x128xf32>
      tpu.vector_store %arg6[%c0_12, %c0_13], %13 {strides = array<i32>} : memref<16x128xf32, #tpu.memory_space<vmem>>, vector<16x128xf32>,
    } else {
    }
    %c0 = arith.constant 0 : index
    %c0_1 = arith.constant 0 : index
    %3 = vector.load %arg6[%c0, %c0_1] : memref<16x128xf32, #tpu.memory_space<vmem>>, vector<16x128xf32>
    %c0_2 = arith.constant 0 : index
    %c0_3 = arith.constant 0 : index
    %4 = vector.load %arg3[%c0_2, %c0_3] : memref<16x256xf32, #tpu.memory_space<vmem>>, vector<16x256xf32>
    %c0_4 = arith.constant 0 : index
    %c0_5 = arith.constant 0 : index
    %c0_6 = arith.constant 0 : index
    %5 = vector.load %arg4[%c0_4, %c0_5, %c0_6] : memref<1x256x128xf32, #tpu.memory_space<vmem>>, vector<1x256x128xf32>
    %6 = vector.shape_cast %5 : vector<1x256x128xf32> to vector<256x128xf32>
    %cst = arith.constant dense<0.000000e+00> : vector<16x128xf32>
    %7 = tpu.matmul %4, %6, %cst {dimension_numbers = #tpu.dot_dimension_numbers<[1], [0], [0], [1], [0, 0, 1, 1], [], []>} : vector<16x256xf32>, vector<256x128xf32>, vector<16x128xf32> -> vector<16x128xf32>
    %8 = arith.addf %3, %7 : vector<16x128xf32>
    %c0_7 = arith.constant 0 : index
    %c0_8 = arith.constant 0 : index
    %9 = vector.load %arg6[%c0_7, %c0_8] : memref<16x128xf32, #tpu.memory_space<vmem>>, vector<16x128xf32>
    tpu.vector_store %arg6[%c0_7, %c0_8], %8 {strides = array<i32>} : memref<16x128xf32, #tpu.memory_space<vmem>>, vector<16x128xf32>,
    %c0_i32_9 = arith.constant 0 : i32
    %10 = arith.cmpi eq, %arg2, %c0_i32_9 : i32
    %11 = arith.extui %10 : i1 to i32
    %c0_i32_10 = arith.constant 0 : i32
    %12 = arith.cmpi ne, %11, %c0_i32_10 : i32
    scf.if %12 {
      %c0_11 = arith.constant 0 : index
      %c0_12 = arith.constant 0 : index
      %13 = vector.load %arg6[%c0_11, %c0_12] : memref<16x128xf32, #tpu.memory_space<vmem>>, vector<16x128xf32>
      %c0_13 = arith.constant 0 : index
      %c0_14 = arith.constant 0 : index
      %c0_15 = arith.constant 0 : index
      %14 = vector.load %arg5[%c0_13, %c0_14, %c0_15] : memref<1x16x128xf32, #tpu.memory_space<vmem>>, vector<1x16x128xf32>
      %15 = vector.shape_cast %14 : vector<1x16x128xf32> to vector<16x128xf32>
      %16 = vector.shape_cast %13 : vector<16x128xf32> to vector<1x16x128xf32>
      tpu.vector_store %arg5[%c0_13, %c0_14, %c0_15], %16 {strides = array<i32>} : memref<1x16x128xf32, #tpu.memory_space<vmem>>, vector<1x16x128xf32>,
    } else {
    }
    return
  }
  func.func @transform_0(%arg0: i32, %arg1: i32, %arg2: i32) -> (i32, i32) {
    %c0_i32 = arith.constant 0 : i32
    %c0_i32_0 = arith.constant 0 : i32
    return %c0_i32, %arg2 : i32, i32
  }
  func.func @transform_1(%arg0: i32, %arg1: i32, %arg2: i32) -> (i32, i32, i32) {
    %c0_i32 = arith.constant 0 : i32
    return %arg0, %arg2, %arg1 : i32, i32, i32
  }
  func.func @transform_2(%arg0: i32, %arg1: i32, %arg2: i32) -> (i32, i32, i32) {
    %c0_i32 = arith.constant 0 : i32
    %c0_i32_0 = arith.constant 0 : i32
    return %arg0, %c0_i32, %arg1 : i32, i32, i32
  }
}

</mosaic_0001>

<bundles_post_ra>
// kernel: downconv_forward.3
= control target key start
LH: loop header
LB: loop body
LE: loop exit
PB: predicated region body
PF: predicated region fallthrough
CT: control target
= control target key end

     0   :  { %vm14_vm0 = vcmask 7168   ;;  %v77_v3 = vmov 0.0   ;;  %s161_s0 = inlined_call_operand.vmem [shape: f32[16,512], index: 0, kind: input, shape index: {}]   ;;  %s162_s2 = inlined_call_operand.vmem [shape: f32[16,1], index: 2, kind: output, shape index: {1}]   ;;  %s163_s1 = inlined_call_operand.vmem [shape: f32[16,1], index: 1, kind: output, shape index: {0}]  }
   0x1   :  { %v19_v0 = vld [vmem:[%s161_s0] sm:$0xff]  ;;  %v20_v1 = vld [vmem:[%s161_s0 + $0x8] sm:$0xff]  ;;  %v21_v2 = vld [vmem:[%s161_s0 + $0x10] sm:$0xff]  ;;  %17 = vst.msk [vmem:[%s162_s2] sm:$0xff] %vm14_vm0, %v77_v3 }
   0x2   :  { %18 = vst.msk [vmem:[%s162_s2 + $0x8] sm:$0xff] %vm14_vm0, %v77_v3  ;;  %v22_v4 = vld [vmem:[%s161_s0 + $0x18] sm:$0xff]  ;;  %v46_v5 = vmul.f32 %v19_v0, %v19_v0  ;;  %v47_v6 = vmul.f32 %v20_v1, %v20_v1  ;;  %v48_v7 = vmul.f32 %v21_v2, %v21_v2  ;;  %v29_v8 = vadd.f32 %v20_v1, %v19_v0  ;;  %v23_v9 = vld [vmem:[%s161_s0 + $0x20] sm:$0xff]  ;;  %v24_v10 = vld [vmem:[%s161_s0 + $0x28] sm:$0xff] }
   0x3   :  { %v25_v11 = vld [vmem:[%s161_s0 + $0x30] sm:$0xff]  ;;  %v26_v12 = vld [vmem:[%s161_s0 + $0x38] sm:$0xff]  ;;  %v50_v13 = vmul.f32 %v23_v9, %v23_v9  ;;  %v51_v14 = vmul.f32 %v24_v10, %v24_v10  ;;  %v34_v15 = vadd.f32 %v24_v10, %v23_v9  ;;  %v49_v16 = vmul.f32 %v22_v4, %v22_v4  ;;  %15 = vst.msk [vmem:[%s163_s1] sm:$0xff] %vm14_vm0, %v77_v3 }
   0x4   :  { %v54_v17 = vadd.f32 %v47_v6, %v46_v5  ;;  %v30_v18 = vadd.f32 %v29_v8, %v21_v2  ;;  %v52_v19 = vmul.f32 %v25_v11, %v25_v11  ;;  %v53_v24 = vmul.f32 %v26_v12, %v26_v12  ;;  %16 = vst.msk [vmem:[%s163_s1 + $0x8] sm:$0xff] %vm14_vm0, %v77_v3 }
   0x5   :  { %v59_v20 = vadd.f32 %v51_v14, %v50_v13  ;;  %v35_v21 = vadd.f32 %v34_v15, %v25_v11 }
   0x6   :  { %v55_v22 = vadd.f32 %v54_v17, %v48_v7  ;;  %v31_v23 = vadd.f32 %v30_v18, %v22_v4 }
   0x7   :  { %v60_v25 = vadd.f32 %v59_v20, %v52_v19  ;;  %v36_v27 = vadd.f32 %v35_v21, %v26_v12 }
   0x8   :  { %v56_v26 = vadd.f32 %v55_v22, %v49_v16  ;;  %32 = vadd.xlane.f32.xlu0 %v31_v23  ;;  %v44_v30 = vld [vmem:[%s162_s2] sm:$0xff] }
   0x9   :  { %v61_v28 = vadd.f32 %v60_v25, %v53_v24  ;;  %v45_v36 = vld [vmem:[%s162_s2 + $0x8] sm:$0xff] }
   0xa   :  { %57 = vadd.xlane.f32.xlu1 %v56_v26  ;;  %v27_v29 = vld [vmem:[%s163_s1] sm:$0xff] }
   0xb   :  { %v28_v34 = vld [vmem:[%s163_s1 + $0x8] sm:$0xff] }
   0xc   :  { %37 = vadd.xlane.f32.xlu0 %v36_v27 }
   0xe   :  { %62 = vadd.xlane.f32.xlu1 %v61_v28 }
  0x91   :  { %v33_v31 = vpop.xlane.xlu0 %32 }
  0x92   :  { %v39_v32 = vadd.f32 %v33_v31, %v27_v29 }
  0x93   :  { %v58_v33 = vpop.xlane.xlu1 %57 }
  0x94   :  { %v64_v35 = vadd.f32 %v58_v33, %v44_v30  ;;  %42 = vst.msk [vmem:[%s163_s1] sm:$0xff] %vm14_vm0, %v39_v32 }
  0x95   :  { %v38_v37 = vpop.xlane.xlu0 %37 }
  0x96   :  { %66 = vst.msk [vmem:[%s162_s2] sm:$0xff] %vm14_vm0, %v64_v35  ;;  %v40_v38 = vadd.f32 %v38_v37, %v28_v34 }
  0x97   :  { %v63_v39 = vpop.xlane.xlu1 %62 }
  0x98   :  { %v65_v40 = vadd.f32 %v63_v39, %v45_v36  ;;  %43 = vst.msk [vmem:[%s163_s1 + $0x8] sm:$0xff] %vm14_vm0, %v40_v38 }
  0x9a   :  { %67 = vst.msk [vmem:[%s162_s2 + $0x8] sm:$0xff] %vm14_vm0, %v65_v40 }

// kernel: downconv_forward.4
= control target key start
LH: loop header
LB: loop body
LE: loop exit
PB: predicated region body
PF: predicated region fallthrough
CT: control target
= control target key end

     0   :  { %v85_v0 = vmov 0   ;;  %s166_s2 = inlined_call_operand.vmem [shape: f32[16,1], index: 2, kind: input, shape index: {}]   ;;  %s167_s1 = inlined_call_operand.vmem [shape: f32[16,1], index: 1, kind: input, shape index: {}]   ;;  %s168_s0 = inlined_call_operand.vmem [shape: f32[16,512], index: 0, kind: input, shape index: {}]   ;;  %s169_s3 = inlined_call_operand.vmem [shape: f32[16,512], index: 3, kind: output, shape index: {}]  }
   0x1   :  { %84 = vset.pattern.permute.xlu1 %v85_v0  ;;  %83 = vset.pattern.permute.xlu0 %v85_v0  ;;  %v42_v1 = vld [vmem:[%s166_s2] sm:$0xff]  ;;  %v43_v3 = vld [vmem:[%s166_s2 + $0x8] sm:$0xff]  ;;  %v16_v7 = vld [vmem:[%s168_s0 + $0x10] sm:$0xff] }
   0x2   :  { %v22_v2 = vld [vmem:[%s167_s1] sm:$0xff]  ;;  %46 = vperm.xlu1 %84, %v42_v1   ;;  %v23_v4 = vld [vmem:[%s167_s1 + $0x8] sm:$0xff]  ;;  %v17_v8 = vld [vmem:[%s168_s0 + $0x18] sm:$0xff] }
   0x3   :  { %26 = vperm.xlu0 %83, %v22_v2   ;;  %v14_v5 = vld [vmem:[%s168_s0] sm:$0xff]  ;;  %v15_v6 = vld [vmem:[%s168_s0 + $0x8] sm:$0xff]  ;;  %v20_v21 = vld [vmem:[%s168_s0 + $0x30] sm:$0xff] }
   0x4   :  { %v18_v15 = vld [vmem:[%s168_s0 + $0x20] sm:$0xff]  ;;  %v19_v20 = vld [vmem:[%s168_s0 + $0x28] sm:$0xff]  ;;  %v21_v22 = vld [vmem:[%s168_s0 + $0x38] sm:$0xff] }
   0x6   :  { %51 = vperm.xlu1 %84, %v43_v3  }
   0x7   :  { %31 = vperm.xlu0 %83, %v23_v4  }
  0x7d   :  { %v47_v10 = vpop.permute.xlu1 %46 }
  0x7e   :  { %v27_v9 = vpop.permute.xlu0 %26 }
  0x7f   :  { %v34_v11 = vmul.f32 %v27_v9, %v14_v5  ;;  %v35_v12 = vmul.f32 %v27_v9, %v15_v6  ;;  %v36_v13 = vmul.f32 %v27_v9, %v16_v7  ;;  %v37_v14 = vmul.f32 %v27_v9, %v17_v8 }
  0x81   :  { %v54_v16 = vadd.f32 %v47_v10, %v34_v11  ;;  %v55_v17 = vadd.f32 %v47_v10, %v35_v12  ;;  %v56_v18 = vadd.f32 %v47_v10, %v36_v13  ;;  %v57_v19 = vadd.f32 %v47_v10, %v37_v14  ;;  %v52_v32 = vpop.permute.xlu1 %51 }
  0x82   :  { %v32_v23 = vpop.permute.xlu0 %31 }
  0x83   :  { %v62_v24 = vmax.f32 %v54_v16, 0.0  ;;  %v63_v25 = vmax.f32 %v55_v17, 0.0  ;;  %v64_v26 = vmax.f32 %v56_v18, 0.0  ;;  %v65_v27 = vmax.f32 %v57_v19, 0.0 }
  0x84   :  { %v38_v28 = vmul.f32 %v32_v23, %v18_v15  ;;  %v39_v29 = vmul.f32 %v32_v23, %v19_v20  ;;  %v40_v30 = vmul.f32 %v32_v23, %v20_v21  ;;  %v41_v31 = vmul.f32 %v32_v23, %v21_v22 }
  0x85   :  { %70 = vst [vmem:[%s169_s3] sm:$0xff] %v62_v24  ;;  %71 = vst [vmem:[%s169_s3 + $0x8] sm:$0xff] %v63_v25 }
  0x86   :  { %72 = vst [vmem:[%s169_s3 + $0x10] sm:$0xff] %v64_v26  ;;  %73 = vst [vmem:[%s169_s3 + $0x18] sm:$0xff] %v65_v27  ;;  %v58_v33 = vadd.f32 %v52_v32, %v38_v28  ;;  %v59_v34 = vadd.f32 %v52_v32, %v39_v29  ;;  %v60_v35 = vadd.f32 %v52_v32, %v40_v30 }
  0x87   :  { %v61_v36 = vadd.f32 %v52_v32, %v41_v31 }
  0x88   :  { %v66_v37 = vmax.f32 %v58_v33, 0.0  ;;  %v67_v38 = vmax.f32 %v59_v34, 0.0  ;;  %v68_v39 = vmax.f32 %v60_v35, 0.0 }
  0x89   :  { %v69_v40 = vmax.f32 %v61_v36, 0.0 }
  0x8a   :  { %74 = vst [vmem:[%s169_s3 + $0x20] sm:$0xff] %v66_v37  ;;  %75 = vst [vmem:[%s169_s3 + $0x28] sm:$0xff] %v67_v38 }
  0x8b   :  { %76 = vst [vmem:[%s169_s3 + $0x30] sm:$0xff] %v68_v39  ;;  %77 = vst [vmem:[%s169_s3 + $0x38] sm:$0xff] %v69_v40 }

// kernel: downconv_forward.5
= control target key start
LH: loop header
LB: loop body
LE: loop exit
PB: predicated region body
PF: predicated region fallthrough
CT: control target
= control target key end

     0   :  { %s602_s9 = smov 0   ;;  %s604_s10 = smov 0   ;;  %s685_s0 = inlined_call_operand.vmem [shape: f32[16,256], index: 0, kind: input, shape index: {}]   ;;  %s686_s1 = inlined_call_operand.vmem [shape: f32[2,256,128], index: 1, kind: input, shape index: {}]   ;;  %s687_s2 = inlined_call_operand.vmem [shape: f32[2,16,128], index: 2, kind: output, shape index: {}]  }
   0x1   :  { %s606_s11 = smov 0  }
   0x2 LB: > { %s31_s12 = sadd.s32 1, %s581_s10  ;;  %p460_p0 = scmp.ge.s32.totalorder %s585_s11, 1  ;;  %s585_s11 = sphi %s606_s11, %s12_s11   ;;  %s581_s10 = sphi %s604_s10, %s689_s10   ;;  %s577_s9 = sphi %s602_s9, %s688_s9  }
   0x3   : > { %p33_p1 = scmp.ge.s32.totalorder %s31_s12, 2  ;;  %p156_p2 = scmp.lt.s32.totalorder %s585_s11, 3 }
   0x5   : > { %s691_s12 = smov (%p33_p1, %s31_s12), 0  ;;  %p157_p3 = pnand %p460_p0, %p156_p2 }
   0x6   : > { %p200_p4 = scmp.lt.s32.totalorder (!%p157_p3), %s577_s9, 1 }
   0x7   : > { %160 = sbr.rel (%p157_p3) target bundleno = 246 (0xf6), region = 28 }
   0xc   : > { %v229_v0 = vld [vmem:[%s685_s0 + $0x8] sm:$0xff]  ;;  %v231_v1 = vld [vmem:[%s685_s0 + $0x18] sm:$0xff]  ;;  %s693_s9 = smov (!%p200_p4, %s577_s9), 1  ;;  %v228_v34 = vld [vmem:[%s685_s0] sm:$0xff] }
   0xd   : > { %328 = vmatprep.mubr.f32.mxu0 %v229_v0  ;;  %333 = vmatprep.mubr.f32.mxu1 %v231_v1  ;;  %s467_s17 = sshll.u32 %s693_s9, 8  ;;  %v230_v35 = vld [vmem:[%s685_s0 + $0x10] sm:$0xff]  ;;  %s468_s25 = sshll.u32 %s693_s9, 4 }
   0xe   : > { %s632_s20 = scalar_lea.vmem %s686_s1, %s467_s17  ;;  %s219_s28 = scalar_lea.vmem %s687_s2, %s468_s25 }
   0xf   : > { %v263_v2 = vld [vmem:[%s632_s20 + $0xf8] sm:$0xff]  ;;  %v262_v4 = vld [vmem:[%s632_s20 + $0xf0] sm:$0xff]  ;;  %v261_v6 = vld [vmem:[%s632_s20 + $0xe8] sm:$0xff] }
  0x10   : > { %v247_v3 = vld [vmem:[%s632_s20 + $0x78] sm:$0xff]  ;;  %469 = vmatprep.subr.mxu0 %v263_v2  ;;  %507 = vmatprep.subr.mxu1 %v263_v2  ;;  %v246_v5 = vld [vmem:[%s632_s20 + $0x70] sm:$0xff]  ;;  %v245_v7 = vld [vmem:[%s632_s20 + $0x68] sm:$0xff] }
  0x11   : > { %470 = vmatpush3.msra.mxu0 %v247_v3  ;;  %523 = vmatpush3.msra.mxu1 %v247_v3  ;;  %v260_v8 = vld [vmem:[%s632_s20 + $0xe0] sm:$0xff]  ;;  %v259_v10 = vld [vmem:[%s632_s20 + $0xd8] sm:$0xff]  ;;  %v258_v12 = vld [vmem:[%s632_s20 + $0xd0] sm:$0xff] }
  0x12   : > { %471 = vmatprep.subr.mxu0 %v262_v4  ;;  %508 = vmatprep.subr.mxu1 %v262_v4  ;;  %v244_v9 = vld [vmem:[%s632_s20 + $0x60] sm:$0xff]  ;;  %v243_v11 = vld [vmem:[%s632_s20 + $0x58] sm:$0xff]  ;;  %v242_v13 = vld [vmem:[%s632_s20 + $0x50] sm:$0xff] }
  0x13   : > { %472 = vmatpush3.msra.mxu0 %v246_v5  ;;  %524 = vmatpush3.msra.mxu1 %v246_v5  ;;  %v257_v14 = vld [vmem:[%s632_s20 + $0xc8] sm:$0xff]  ;;  %v256_v16 = vld [vmem:[%s632_s20 + $0xc0] sm:$0xff]  ;;  %v255_v18 = vld [vmem:[%s632_s20 + $0xb8] sm:$0xff] }
  0x14   : > { %473 = vmatprep.subr.mxu0 %v261_v6  ;;  %509 = vmatprep.subr.mxu1 %v261_v6  ;;  %v241_v15 = vld [vmem:[%s632_s20 + $0x48] sm:$0xff]  ;;  %v240_v17 = vld [vmem:[%s632_s20 + $0x40] sm:$0xff]  ;;  %v239_v19 = vld [vmem:[%s632_s20 + $0x38] sm:$0xff] }
  0x15   : > { %474 = vmatpush3.msra.mxu0 %v245_v7  ;;  %525 = vmatpush3.msra.mxu1 %v245_v7  ;;  %v254_v20 = vld [vmem:[%s632_s20 + $0xb0] sm:$0xff]  ;;  %v253_v22 = vld [vmem:[%s632_s20 + $0xa8] sm:$0xff]  ;;  %v252_v24 = vld [vmem:[%s632_s20 + $0xa0] sm:$0xff] }
  0x16   : > { %475 = vmatprep.subr.mxu0 %v260_v8  ;;  %510 = vmatprep.subr.mxu1 %v260_v8  ;;  %v238_v21 = vld [vmem:[%s632_s20 + $0x30] sm:$0xff]  ;;  %v237_v23 = vld [vmem:[%s632_s20 + $0x28] sm:$0xff]  ;;  %v236_v25 = vld [vmem:[%s632_s20 + $0x20] sm:$0xff] }
  0x17   : > { %476 = vmatpush3.msra.mxu0 %v244_v9  ;;  %526 = vmatpush3.msra.mxu1 %v244_v9  ;;  %v251_v26 = vld [vmem:[%s632_s20 + $0x98] sm:$0xff]  ;;  %v250_v28 = vld [vmem:[%s632_s20 + $0x90] sm:$0xff]  ;;  %v249_v30 = vld [vmem:[%s632_s20 + $0x88] sm:$0xff] }
  0x18   : > { %477 = vmatprep.subr.mxu0 %v259_v10  ;;  %511 = vmatprep.subr.mxu1 %v259_v10  ;;  %v235_v27 = vld [vmem:[%s632_s20 + $0x18] sm:$0xff]  ;;  %v234_v29 = vld [vmem:[%s632_s20 + $0x10] sm:$0xff]  ;;  %v233_v31 = vld [vmem:[%s632_s20 + $0x8] sm:$0xff] }
  0x19   : > { %478 = vmatpush3.msra.mxu0 %v243_v11  ;;  %527 = vmatpush3.msra.mxu1 %v243_v11  ;;  %v248_v32 = vld [vmem:[%s632_s20 + $0x80] sm:$0xff] }
  0x1a   : > { %479 = vmatprep.subr.mxu0 %v258_v12  ;;  %512 = vmatprep.subr.mxu1 %v258_v12  ;;  %v232_v33 = vld [vmem:[%s632_s20] sm:$0xff] }
  0x1b   : > { %480 = vmatpush3.msra.mxu0 %v242_v13  ;;  %528 = vmatpush3.msra.mxu1 %v242_v13 }
  0x1c   : > { %481 = vmatprep.subr.mxu0 %v257_v14  ;;  %513 = vmatprep.subr.mxu1 %v257_v14 }
  0x1d   : > { %482 = vmatpush3.msra.mxu0 %v241_v15  ;;  %529 = vmatpush3.msra.mxu1 %v241_v15 }
  0x1e   : > { %483 = vmatprep.subr.mxu0 %v256_v16  ;;  %514 = vmatprep.subr.mxu1 %v256_v16 }
  0x1f   : > { %484 = vmatpush3.msra.mxu0 %v240_v17  ;;  %530 = vmatpush3.msra.mxu1 %v240_v17 }
  0x20   : > { %485 = vmatprep.subr.mxu0 %v255_v18  ;;  %515 = vmatprep.subr.mxu1 %v255_v18 }
  0x21   : > { %486 = vmatpush3.msra.mxu0 %v239_v19  ;;  %531 = vmatpush3.msra.mxu1 %v239_v19 }
  0x22   : > { %487 = vmatprep.subr.mxu0 %v254_v20  ;;  %516 = vmatprep.subr.mxu1 %v254_v20 }
  0x23   : > { %488 = vmatpush3.msra.mxu0 %v238_v21  ;;  %532 = vmatpush3.msra.mxu1 %v238_v21 }
  0x24   : > { %489 = vmatprep.subr.mxu0 %v253_v22  ;;  %517 = vmatprep.subr.mxu1 %v253_v22 }
  0x25   : > { %490 = vmatpush3.msra.mxu0 %v237_v23  ;;  %533 = vmatpush3.msra.mxu1 %v237_v23 }
  0x26   : > { %491 = vmatprep.subr.mxu0 %v252_v24  ;;  %518 = vmatprep.subr.mxu1 %v252_v24 }
  0x27   : > { %492 = vmatpush3.msra.mxu0 %v236_v25  ;;  %534 = vmatpush3.msra.mxu1 %v236_v25 }
  0x28   : > { %493 = vmatprep.subr.mxu0 %v251_v26  ;;  %519 = vmatprep.subr.mxu1 %v251_v26 }
  0x29   : > { %494 = vmatpush3.msra.mxu0 %v235_v27  ;;  %535 = vmatpush3.msra.mxu1 %v235_v27 }
  0x2a   : > { %495 = vmatprep.subr.mxu0 %v250_v28  ;;  %520 = vmatprep.subr.mxu1 %v250_v28 }
  0x2b   : > { %496 = vmatpush3.msra.mxu0 %v234_v29  ;;  %536 = vmatpush3.msra.mxu1 %v234_v29 }
  0x2c   : > { %497 = vmatprep.subr.mxu0 %v249_v30  ;;  %521 = vmatprep.subr.mxu1 %v249_v30 }
  0x2d   : > { %498 = vmatpush3.msra.mxu0 %v233_v31  ;;  %537 = vmatpush3.msra.mxu1 %v233_v31 }
  0x2e   : > { %499 = vmatprep.subr.mxu0 %v248_v32  ;;  %522 = vmatprep.subr.mxu1 %v248_v32 }
  0x2f   : > { %500 = vmatpush3.msra.mxu0 %v232_v33  ;;  %538 = vmatpush3.msra.mxu1 %v232_v33 }
  0x30   : > { %329 = vmatmul.mubr.f32.vlgmr.msra.gmra.mxu0 %v228_v34  ;;  %334 = vmatmul.mubr.f32.vlgmr.msra.gmra.mxu1 %v230_v35 }
  0xf0   : > { %v501_v36 = vpop.f32.mrf.mxu0  ;;  %v504_v37 = vpop.f32.mrf.mxu1 }
  0xf2   : > { %v502_v38 = vpop.f32.mrf.mxu0  ;;  %v505_v39 = vpop.f32.mrf.mxu1 }
  0xf3   : > { %v503_v40 = vadd.f32 %v502_v38, %v501_v36  ;;  %v506_v41 = vadd.f32 %v505_v39, %v504_v37 }
  0xf5   : > { %348 = vst [vmem:[%s219_s28] sm:$0xff] %v503_v40  ;;  %349 = vst [vmem:[%s219_s28 + $0x8] sm:$0xff] %v506_v41 }
  0xf6 PF: > { %s12_s11 = sadd.s32 1, %s585_s11   ;;  %s688_s9 = smov %s581_s10 }
  0xf7   : > { %p9_p5 = scmp.ge.s32.totalorder %s12_s11, 4   ;;  %s689_s10 = smov %s691_s12 }
  0xf9   :  { %11 = sbr.rel (!%p9_p5) target bundleno = 2 (0x2), region = 69 }

</bundles_post_ra>
